<compile_context>
chip_gen: v7x
topology: tpu7x:2x2x1
jax: 0.10.0
libtpu: 0.0.40
codegen_flags: <defaults>
</compile_context>

<pallas_src>
import jax
import jax.numpy as jnp
from jax.experimental import pallas as pl
from jax.experimental.pallas import tpu as pltpu


def flow_log_det_jacobian_kernel(z_ref, w_ref, s_ref, b_ref, o_ref):
    # z_ref: (TB, D) VMEM, w_ref: (1, D) VMEM, s_ref: (1, D) VMEM,
    # b_ref: (1,) SMEM, o_ref: (TB, 1) VMEM
    z = z_ref[...]                       # (TB, D)
    w = w_ref[...]                       # (1, D)
    s = s_ref[...]                       # (1, D)
    b = b_ref[0]                         # scalar (SMEM)

    # activation = z @ weight.T + bias  ->  VPU multiply + lane reduction
    act = jnp.sum(z * w, axis=-1, keepdims=True) + b          # (TB, 1)

    # h = 1 - tanh(act)^2
    t = jnp.tanh(act)
    h = 1.0 - t * t                                            # (TB, 1)

    # psi @ scale.T == h * (weight . scale)   (scalar dot, computed per tile)
    ws = jnp.sum(w * s)                                        # scalar

    det = 1.0 + h * ws                                         # (TB, 1)
    o_ref[...] = jnp.log(jnp.abs(det) + 1e-7).astype(o_ref.dtype)


def _pick_batch_tile(B, D, max_rows=512):
    # Keep the z tile around <=2 MiB so a double-buffered pipeline stays well
    # inside v7x's smaller scoped-VMEM budget (also fine on v5e/v6e).
    target_bytes = 2 * 1024 * 1024
    tb = target_bytes // (D * 4)
    tb = max(8, min(max_rows, (tb // 8) * 8))
    if B <= tb:
        return B          # single block equal to the full batch dim (always legal)
    return tb


def flow_log_det_jacobian(z, weight, bias, scale):
    z = z.astype(jnp.float32)
    weight = jnp.asarray(weight, jnp.float32).reshape(1, -1)
    scale = jnp.asarray(scale, jnp.float32).reshape(1, -1)
    bias1d = jnp.asarray(bias, jnp.float32).reshape(1)

    B, D = z.shape
    assert weight.shape == (1, D)
    assert scale.shape == (1, D)

    tb = _pick_batch_tile(B, D)
    b_pad = pl.cdiv(B, tb) * tb
    z_in = jnp.pad(z, ((0, b_pad - B), (0, 0))) if b_pad != B else z
    grid = (b_pad // tb,)

    out = pl.pallas_call(
        flow_log_det_jacobian_kernel,
        out_shape=jax.ShapeDtypeStruct((b_pad, 1), jnp.float32),
        grid_spec=pltpu.PrefetchScalarGridSpec(
            num_scalar_prefetch=0,
            grid=grid,
            in_specs=[
                pl.BlockSpec((tb, D), lambda i: (i, 0)),   # z: tiled over batch
                pl.BlockSpec((1, D), lambda i: (0, 0)),    # weight: resident
                pl.BlockSpec((1, D), lambda i: (0, 0)),    # scale: resident
                pl.BlockSpec(memory_space=pltpu.MemorySpace.SMEM),  # bias scalar
            ],
            out_specs=pl.BlockSpec((tb, 1), lambda i: (i, 0)),
        ),
        compiler_params=pltpu.CompilerParams(
            # Rows are independent -> batch tiles can be sharded across
            # TensorCores on v7x; harmless no-op on v5e/v6e.
            dimension_semantics=("parallel",),
        ),
    )(z_in, weight, scale, bias1d)

    return out[:B]


def reference(z, weight, bias, scale):
    act = z @ weight.T + bias                     # (B, 1)
    psi = (1.0 - jnp.tanh(act) ** 2) * weight     # (B, D)
    det = 1.0 + psi @ scale.T                     # (B, 1)
    return jnp.log(jnp.abs(det) + 1e-7)


if __name__ == "__main__":
    key = jax.random.PRNGKey(0)
    kz, kw, kb, ks = jax.random.split(key, 4)

    # Small shape consistent with the module (batch=8, hidden=32).
    B, D = 8, 32
    z = jax.random.normal(kz, (B, D), dtype=jnp.float32)
    weight = jax.random.normal(kw, (1, D), dtype=jnp.float32) * 0.1
    bias = jax.random.normal(kb, (1,), dtype=jnp.float32) * 0.1
    scale = jax.random.normal(ks, (1, D), dtype=jnp.float32) * 0.1

    out = flow_log_det_jacobian(z, weight, bias, scale)
    out = jax.block_until_ready(out)
    ref = reference(z, weight, bias, scale)
    assert out.shape == (B, 1)
    assert jnp.allclose(out, ref, atol=1e-5, rtol=1e-5), (out, ref)

    # Second check: batch larger than one tile, exercising the padded
    # multi-block (pipelined) path.
    B2 = 1200
    z2 = jax.random.normal(kz, (B2, D), dtype=jnp.float32)
    out2 = jax.block_until_ready(flow_log_det_jacobian(z2, weight, bias, scale))
    ref2 = reference(z2, weight, bias, scale)
    assert out2.shape == (B2, 1)
    assert jnp.allclose(out2, ref2, atol=1e-5, rtol=1e-5)

    print("KERNEL_OK")
</pallas_src>

<mosaic_0001>
module attributes {stable_mosaic.version = 11 : i64} {
  func.func @flow_log_det_jacobian_kernel(%arg0: i32, %arg1: memref<8x32xf32, #tpu.memory_space<vmem>>, %arg2: memref<1x32xf32, #tpu.memory_space<vmem>>, %arg3: memref<1x32xf32, #tpu.memory_space<vmem>>, %arg4: memref<1xf32, #tpu.memory_space<smem>>, %arg5: memref<8x1xf32, #tpu.memory_space<vmem>>) attributes {dimension_semantics = [#tpu.dimension_semantics<parallel>], iteration_bounds = array<i64: 1>, scalar_prefetch = 0 : i64, scratch_operands = 0 : i64, tpu.core_type = #tpu.core_type<tc>, window_params = [{transform_indices = @transform_0, window_bounds = array<i64: 8, 32>}, {pipeline_mode = #tpu.pipeline_mode<synchronous>, transform_indices = @transform_1, window_bounds = array<i64: 1, 32>}, {pipeline_mode = #tpu.pipeline_mode<synchronous>, transform_indices = @transform_2, window_bounds = array<i64: 1, 32>}, {transform_indices = @transform_3, window_bounds = array<i64: 1>}, {transform_indices = @transform_4, window_bounds = array<i64: 8, 1>}]} {
    %c0 = arith.constant 0 : index
    %c0_0 = arith.constant 0 : index
    %0 = vector.load %arg1[%c0, %c0_0] : memref<8x32xf32, #tpu.memory_space<vmem>>, vector<8x32xf32>
    %c0_1 = arith.constant 0 : index
    %c0_2 = arith.constant 0 : index
    %1 = vector.load %arg2[%c0_1, %c0_2] : memref<1x32xf32, #tpu.memory_space<vmem>>, vector<1x32xf32>
    %c0_3 = arith.constant 0 : index
    %c0_4 = arith.constant 0 : index
    %2 = vector.load %arg3[%c0_3, %c0_4] : memref<1x32xf32, #tpu.memory_space<vmem>>, vector<1x32xf32>
    %c0_5 = arith.constant 0 : index
    %3 = memref.load %arg4[%c0_5] : memref<1xf32, #tpu.memory_space<smem>>
    %4 = vector.broadcast %1 : vector<1x32xf32> to vector<8x32xf32>
    %5 = arith.mulf %0, %4 : vector<8x32xf32>
    %cst = arith.constant dense<0.000000e+00> : vector<8xf32>
    %6 = vector.multi_reduction <add>, %5, %cst [1] : vector<8x32xf32> to vector<8xf32>
    %7 = vector.shape_cast %6 : vector<8xf32> to vector<8x1xf32>
    %8 = vector.broadcast %3 : f32 to vector<8x1xf32>
    %9 = arith.addf %7, %8 : vector<8x1xf32>
    %10 = math.tanh %9 : vector<8x1xf32>
    %11 = arith.mulf %10, %10 : vector<8x1xf32>
    %cst_6 = arith.constant 1.000000e+00 : f32
    %12 = vector.broadcast %cst_6 : f32 to vector<8x1xf32>
    %13 = arith.subf %12, %11 : vector<8x1xf32>
    %14 = arith.mulf %1, %2 : vector<1x32xf32>
    %15 = vector.shape_cast %14 : vector<1x32xf32> to vector<1x1x32xf32>
    %cst_7 = arith.constant dense<0.000000e+00> : vector<1xf32>
    %16 = vector.multi_reduction <add>, %15, %cst_7 [1, 2] : vector<1x1x32xf32> to vector<1xf32>
    %17 = vector.shape_cast %16 : vector<1xf32> to vector<1x1x1xf32>
    %18 = vector.extract %17[0, 0, 0] : f32 from vector<1x1x1xf32>
    %19 = vector.broadcast %18 : f32 to vector<8x1xf32>
    %20 = arith.mulf %13, %19 : vector<8x1xf32>
    %cst_8 = arith.constant 1.000000e+00 : f32
    %21 = vector.broadcast %cst_8 : f32 to vector<8x1xf32>
    %22 = arith.addf %21, %20 : vector<8x1xf32>
    %23 = math.absf %22 : vector<8x1xf32>
    %cst_9 = arith.constant 1.000000e-07 : f32
    %24 = vector.broadcast %cst_9 : f32 to vector<8x1xf32>
    %25 = arith.addf %23, %24 : vector<8x1xf32>
    %26 = math.log %25 : vector<8x1xf32>
    %c0_10 = arith.constant 0 : index
    %c0_11 = arith.constant 0 : index
    %27 = vector.load %arg5[%c0_10, %c0_11] : memref<8x1xf32, #tpu.memory_space<vmem>>, vector<8x1xf32>
    tpu.vector_store %arg5[%c0_10, %c0_11], %26 {strides = array<i32>} : memref<8x1xf32, #tpu.memory_space<vmem>>, vector<8x1xf32>,
    return
  }
  func.func @transform_0(%arg0: i32) -> (i32, i32) {
    %c0_i32 = arith.constant 0 : i32
    %c0_i32_0 = arith.constant 0 : i32
    return %arg0, %c0_i32 : i32, i32
  }
  func.func @transform_1(%arg0: i32) -> (i32, i32) {
    %c0_i32 = arith.constant 0 : i32
    %c0_i32_0 = arith.constant 0 : i32
    %c0_i32_1 = arith.constant 0 : i32
    return %c0_i32, %c0_i32_0 : i32, i32
  }
  func.func @transform_2(%arg0: i32) -> (i32, i32) {
    %c0_i32 = arith.constant 0 : i32
    %c0_i32_0 = arith.constant 0 : i32
    %c0_i32_1 = arith.constant 0 : i32
    return %c0_i32, %c0_i32_0 : i32, i32
  }
  func.func @transform_3(%arg0: i32) -> i32 {
    %c0_i32 = arith.constant 0 : i32
    %c0_i32_0 = arith.constant 0 : i32
    return %c0_i32 : i32
  }
  func.func @transform_4(%arg0: i32) -> (i32, i32) {
    %c0_i32 = arith.constant 0 : i32
    %c0_i32_0 = arith.constant 0 : i32
    return %arg0, %c0_i32 : i32, i32
  }
}

</mosaic_0001>

<bundles_post_ra>
// kernel: tpu_custom_call.1
= control target key start
LH: loop header
LB: loop body
LE: loop exit
PB: predicated region body
PF: predicated region fallthrough
CT: control target
= control target key end

     0   :  { %10 = vsyncpa [#allocation4], 0  ;;  %s107_s15 = smov [#allocation3]   ;;  %s157_s0 = inlined_call_operand.hbm [shape: f32[8,32], index: 0, kind: input, shape index: {}]   ;;  %s158_s1 = inlined_call_operand.vmem [shape: f32[1,32], index: 1, kind: input, shape index: {}]   ;;  %s159_s2 = inlined_call_operand.vmem [shape: f32[1,32], index: 2, kind: input, shape index: {}]   ;;  %s160_s3 = inlined_call_operand.<no memory space> [shape: f32[1], index: 3, kind: input, shape index: {}]   ;;  %s161_s4 = inlined_call_operand.vmem [shape: f32[8,1], index: 4, kind: output, shape index: {}]  }
   0x1   :  { %s17_s16 = sshll.u32 %s107_s15, 4  ;;  %s83_s19 = scalar_lea.hbm %s157_s0, 128  ;;  %s18_s16 = int_to_ptr.vmem [resolvable:$true] %s17_s16 }
   0x2   :  { %p84_p0 = scmp.ne.s32.totalorder %s157_s0, %s83_s19  ;;  %p87_p1 = scmp.lt.u32.totalorder %s83_s19, %s157_s0 }
   0x4   :  { %p89_p2 = pnand %p87_p1, %p84_p0 }
   0x6   :  { %92 = shalt.err (!%p89_p2)
}
   0x7   :  { %s93_s24 = scalar_lea.vmem %s18_s16, 128  ;;  %p98_p4 = scmp.lt.s32.totalorder %s18_s16, %s18_s16 }
   0x8   :  { %p94_p3 = scmp.ne.s32.totalorder %s18_s16, %s93_s24  ;;  %p99_p5 = scmp.lt.s32.totalorder %s93_s24, %s93_s24 }
   0xa   :  { %p100_p6 = por %p99_p5, %p98_p4 }
   0xc   :  { %p101_p7 = pnand %p100_p6, %p94_p3 }
   0xe   :  { %104 = shalt.err (!%p101_p7)
}
   0xf   :  { %20 = dma.hbm_to_vmem [thread:$0]  %s157_s0, 128, %s18_s16, [#allocation4]  }
  0x10   :  { %105 = dma.done.wait [#allocation4], 128  }
  0x11   :  { %106 = vsyncadd [#allocation4], 4294967168  ;;  %v35_v0 = vlaneseq  ;;  %v31_v3 = vld [vmem:[%s158_s1] sm:$0x1]  ;;  %vm51_vm0 = vcmask 253952   ;;  %vm41_vm1 = vcmask 261120   ;;  %v45_v18 = vstv %s160_s3 }
  0x12   :  { %v32_v4 = vld [vmem:[%s159_s2] sm:$0x1]  ;;  %vm69_vm2 = vcmask 7168  }
  0x13   :  { %v36_v1 = vshrl.u32 %v35_v0, 7  ;;  %v30_v5 = vld [vmem:[#allocation3] sm:$0xff]  ;;  %v50_v6 = vmul.f32 %v32_v4, %v31_v3 }
  0x15   :  { %v37_v2 = vsub.s32 0, %v36_v1  ;;  %v52_v8 = vsel %vm51_vm0, %v50_v6, 0.0 }
  0x16   :  { %53 = vadd.xlane.f32.xlu0 %v52_v8 }
  0x17   :  { %v38_v7 = vrot.slane %v31_v3, %v37_v2 }
  0x19   :  { %v40_v9 = vmul.f32 %v38_v7, %v30_v5 }
  0x1b   :  { %v42_v10 = vsel %vm41_vm1, %v40_v9, 0.0 }
  0x1c   :  { %43 = vadd.xlane.f32.xlu0 %v42_v10 }
  0xa3   :  { %v54_v11 = vpop.xlane.xlu0 %53 }
  0xa4   :  { %v55_v12 = vrot.slane %v54_v11, 4 }
  0xa6   :  { %v56_v13 = vadd.f32 %v55_v12, %v54_v11 }
  0xa8   :  { %v57_v14 = vrot.slane %v56_v13, 2 }
  0xa9   :  { %v44_v19 = vpop.xlane.xlu0 %43 }
  0xaa   :  { %v58_v15 = vadd.f32 %v57_v14, %v56_v13  ;;  %v46_v20 = vadd.f32 %v45_v18, %v44_v19 }
  0xac   :  { %v59_v16 = vrot.slane %v58_v15, 1  ;;  %79 = vtanh.f32 %v46_v20 }
  0xae   :  { %v60_v17 = vadd.f32 %v59_v16, %v58_v15 }
  0xb0   :  { %76 = vpush %v60_v17 }
  0xb6   :  { %v80_v21 = vpop.eup %79 }
  0xb7   :  { %v48_v22 = vmul.f32 %v80_v21, %v80_v21 }
  0xb9   :  { %v49_v23 = vsub.f32 1.0, %v48_v22 }
  0xe1   :  { %s77_s2 = spop %76 }
  0xe2   :  { %v62_v24 = vstv %s77_s2 }
  0xe3   :  { %v63_v25 = vmul.f32 %v62_v24, %v49_v23 }
  0xe5   :  { %v64_v26 = vadd.f32 1.0, %v63_v25 }
  0xe7   :  { %v65_v27 = vand.u32 2147483647, %v64_v26 }
  0xe9   :  { %v66_v28 = vadd.f32 1e-07, %v65_v27 }
  0xeb   :  { %81 = vlog2.f32 %v66_v28 }
  0xf5   :  { %v82_v29 = vpop.eup %81 }
  0xf6   :  { %v68_v30 = vmul.f32 0.6931472, %v82_v29 }
  0xf8   :  { %70 = vst.msk [vmem:[%s161_s4] sm:$0xff] %vm69_vm2, %v68_v30 }
  0xf9   :  { %75 = vsyncpa [#allocation4], 1 }

</bundles_post_ra>
